<compile_context>
chip_gen: v7x
topology: tpu7x:2x2x1
jax: 0.10.0
libtpu: 0.0.40
codegen_flags: <defaults>
</compile_context>

<pallas_src>
import functools

import jax
import jax.numpy as jnp
from jax.experimental import pallas as pl
from jax.experimental.pallas import tpu as pltpu

_LANE = 128
_TC_MAX = 8192      # max class-chunk width (lanes) per grid step
_TB_MAX = 1024      # max batch-tile height (rows)
_NEG_BIG = float(jnp.finfo(jnp.float32).min) / 2.0   # finite, exp() -> 0, no 0*inf NaN


def _round_up(x, m):
    return (x + m - 1) // m * m


def _vmem_budget():
    """(vmem_limit_bytes, block_bytes_budget) sized to the actual generation."""
    try:
        cap = int(pltpu.get_tpu_info().vmem_capacity_bytes)
    except Exception:                       # no TPU info -> conservative default
        cap = 64 << 20
    # 32 MiB scoped limit on v7x (64 MiB physical), 64 MiB on v5e/v6e (128 MiB)
    vmem_limit = min(max(cap // 2, 32 << 20), 96 << 20)
    return vmem_limit, vmem_limit // 2      # ~2x headroom for temps / pipelining


def _choose_tiles(B, C, in_bytes, block_budget):
    """Pick (tb, tc): the largest lane-dense class chunk <= _TC_MAX, then the
    largest sublane-multiple batch tile whose double-buffered block plus live
    f32/i32 intermediates fits `block_budget`.  If even a sublane-high block
    does not fit, tc is halved (tb is never rounded up past the budget)."""
    sublane = 16 if in_bytes == 2 else 8
    # 2x input (double-buffered DMA) + ~16 B/elem of live f32/i32 temporaries
    per_elem = 2 * in_bytes + 16

    tc = min(_round_up(C, _LANE), _TC_MAX)

    def rows_for(tc_):
        return (block_budget // (tc_ * per_elem)) // sublane * sublane

    while tc > _LANE and rows_for(tc) < sublane:
        tc = _round_up(max(_LANE, tc // 2), _LANE)

    b_ceil = _round_up(B, sublane)
    tb = max(sublane, min(rows_for(tc), _TB_MAX, b_ceil))
    tb = tb // sublane * sublane
    # prefer a tile that divides the sublane-padded batch (minimal row padding)
    for cand in range(tb, sublane - 1, -sublane):
        if b_ceil % cand == 0:
            return cand, tc
    return tb, tc


def _label_smoothing_kernel(x_ref, tgt_ref, loss_ref, m_sc, s_sc, wz_sc, *,
                            eps, num_classes, ignore_index, block_c, padded_c):
    k = pl.program_id(1)                                    # class-chunk index

    @pl.when(k == 0)
    def _init():
        m_sc[...] = jnp.full(m_sc.shape, _NEG_BIG, jnp.float32)
        s_sc[...] = jnp.zeros(s_sc.shape, jnp.float32)
        wz_sc[...] = jnp.zeros(wz_sc.shape, jnp.float32)

    x = x_ref[...].astype(jnp.float32)                      # (tb, tc) f32
    tgt = tgt_ref[...]                                       # (tb, 1)  i32
    tgt_safe = jnp.where(tgt == ignore_index, 0, tgt)

    # ---- online softmax normalizer (running max + rescaled sum_exp) --------
    chunk_max = jnp.max(x, axis=-1, keepdims=True)
    m_new = jnp.maximum(m_sc[...], chunk_max)
    alpha = jnp.exp(m_sc[...] - m_new)
    s_sc[...] = s_sc[...] * alpha + jnp.sum(jnp.exp(x - m_new), axis=-1,
                                            keepdims=True)
    m_sc[...] = m_new

    # ---- fused smoothed-label weighted sum of raw logits -------------------
    # w = eps/C on real classes, (1 - eps) on the target class, 0 on pad lanes
    uni = eps / num_classes
    cls = jax.lax.broadcasted_iota(jnp.int32, x.shape, 1) + k * block_c
    w = jnp.where(cls == tgt_safe, 1.0 - eps, uni)
    if padded_c != num_classes:     # static: only emitted when the tail is padded
        w = jnp.where(cls < num_classes, w, 0.0)
    wz_sc[...] = wz_sc[...] + jnp.sum(w * x, axis=-1, keepdims=True)

    # ---- finalize on the last class chunk -----------------------------------
    @pl.when(k == pl.num_programs(1) - 1)
    def _finalize():
        lse = m_sc[...] + jnp.log(s_sc[...])
        non_pad = jnp.where(tgt == ignore_index, 0.0, 1.0)
        sum_w = 1.0 - eps / num_classes                      # = C*(eps/C) + (1-eps-eps/C)
        loss_ref[...] = (sum_w * lse - wz_sc[...]) * non_pad


def label_smoothing_loss(output, target, *, label_smoothing, tgt_vocab_size,
                         ignore_index=-100, block_batch=None, block_classes=None):
    """output: (B, C) float (bf16 recommended on v5e/v6e), target: (B,) int.
    Returns the per-sample smoothed-label loss (B,) float32."""
    B, C = output.shape
    assert C == tgt_vocab_size
    assert 0.0 < label_smoothing <= 1.0

    in_bytes = jnp.dtype(output.dtype).itemsize
    vmem_limit, block_budget = _vmem_budget()
    auto_tb, auto_tc = _choose_tiles(B, C, in_bytes, block_budget)
    tb = auto_tb if block_batch is None else int(block_batch)
    tc = auto_tc if block_classes is None else int(block_classes)
    assert tc % _LANE == 0

    c_pad = _round_up(C, tc)
    b_pad = _round_up(B, tb)

    if c_pad != C or b_pad != B:
        # finite large-negative pad: exp underflows to 0, w=0 kills it in the sum
        output = jnp.pad(output, ((0, b_pad - B), (0, c_pad - C)),
                         constant_values=_NEG_BIG)
    tgt = target.astype(jnp.int32)
    if b_pad != B:
        tgt = jnp.pad(tgt, (0, b_pad - B), constant_values=ignore_index)
    tgt2d = tgt.reshape(b_pad, 1)

    kernel = functools.partial(
        _label_smoothing_kernel,
        eps=float(label_smoothing),
        num_classes=int(tgt_vocab_size),
        ignore_index=int(ignore_index),
        block_c=int(tc),
        padded_c=int(c_pad),
    )

    loss2d = pl.pallas_call(
        kernel,
        out_shape=jax.ShapeDtypeStruct((b_pad, 1), jnp.float32),
        grid_spec=pltpu.PrefetchScalarGridSpec(
            num_scalar_prefetch=0,
            grid=(b_pad // tb, c_pad // tc),
            in_specs=[
                pl.BlockSpec((tb, tc), lambda i, k: (i, k)),   # logits chunk
                pl.BlockSpec((tb, 1), lambda i, k: (i, 0)),    # targets (once / tile)
            ],
            out_specs=pl.BlockSpec((tb, 1), lambda i, k: (i, 0)),
            scratch_shapes=[
                pltpu.VMEM((tb, 1), jnp.float32),   # running max
                pltpu.VMEM((tb, 1), jnp.float32),   # running sum_exp
                pltpu.VMEM((tb, 1), jnp.float32),   # running sum(w * logits)
            ],
        ),
        compiler_params=pltpu.CompilerParams(
            dimension_semantics=("parallel", "arbitrary"),
            vmem_limit_bytes=vmem_limit),
    )(output, tgt2d)
    return loss2d.reshape(b_pad)[:B]


def _reference(output, target, eps, num_classes, ignore_index=-100):
    non_pad = (target != ignore_index).astype(jnp.float32)
    tgt_safe = jnp.where(target == ignore_index, 0, target)
    one_hot = jax.nn.one_hot(tgt_safe, num_classes, dtype=jnp.float32)
    one_hot = one_hot * (1.0 - eps) + (1.0 - one_hot) * eps / num_classes
    log_prb = jax.nn.log_softmax(output.astype(jnp.float32), axis=-1)
    loss = -(one_hot * log_prb).sum(axis=-1)
    return loss * non_pad


if __name__ == "__main__":
    eps = 0.1
    ignore_index = -100
    key = jax.random.PRNGKey(0)
    k1, k2, k3, k4, k5, k6 = jax.random.split(key, 6)

    # --- test 1: aligned shapes (B=8, C=128), single block, f32 -------------
    B, C = 8, 128
    logits = jax.random.normal(k1, (B, C), dtype=jnp.float32)
    target = jax.random.randint(k2, (B,), 0, C, dtype=jnp.int32)
    target = target.at[1].set(ignore_index).at[5].set(ignore_index)
    loss = jax.block_until_ready(label_smoothing_loss(
        logits, target, label_smoothing=eps, tgt_vocab_size=C,
        ignore_index=ignore_index))
    ref = _reference(logits, target, eps, C, ignore_index)
    assert loss.shape == (B,)
    assert jnp.allclose(loss, ref, atol=1e-5, rtol=1e-5), (loss, ref)

    # --- test 2: ragged batch + non-128 vocab + forced class tiling ---------
    # (exercises the online-softmax multi-chunk path and the padded-tail mask)
    B2, C2 = 10, 300
    logits2 = jax.random.normal(k3, (B2, C2), dtype=jnp.float32)
    target2 = jax.random.randint(k4, (B2,), 0, C2, dtype=jnp.int32)
    target2 = target2.at[3].set(ignore_index)
    loss2 = jax.block_until_ready(label_smoothing_loss(
        logits2, target2, label_smoothing=eps, tgt_vocab_size=C2,
        ignore_index=ignore_index, block_classes=128))
    ref2 = _reference(logits2, target2, eps, C2, ignore_index)
    assert loss2.shape == (B2,)
    assert jnp.allclose(loss2, ref2, atol=1e-5, rtol=1e-5), (loss2, ref2)

    # --- test 3: bf16 input path (recommended on v5e/v6e) -------------------
    B3, C3 = 16, 200
    logits3 = jax.random.normal(k5, (B3, C3), dtype=jnp.float32).astype(jnp.bfloat16)
    target3 = jax.random.randint(k6, (B3,), 0, C3, dtype=jnp.int32)
    target3 = target3.at[0].set(ignore_index)
    loss3 = jax.block_until_ready(label_smoothing_loss(
        logits3, target3, label_smoothing=eps, tgt_vocab_size=C3,
        ignore_index=ignore_index))
    ref3 = _reference(logits3, target3, eps, C3, ignore_index)
    assert loss3.shape == (B3,)
    assert jnp.allclose(loss3, ref3, atol=1e-4, rtol=1e-4), (loss3, ref3)

    print("KERNEL_OK")
</pallas_src>

<mosaic_0001>
module attributes {stable_mosaic.version = 11 : i64} {
  func.func @_label_smoothing_kernel(%arg0: i32, %arg1: i32, %arg2: memref<8x128xf32, #tpu.memory_space<vmem>>, %arg3: memref<8x1xi32, #tpu.memory_space<vmem>>, %arg4: memref<8x1xf32, #tpu.memory_space<vmem>>, %arg5: memref<8x1xf32, #tpu.memory_space<vmem>>, %arg6: memref<8x1xf32, #tpu.memory_space<vmem>>, %arg7: memref<8x1xf32, #tpu.memory_space<vmem>>) attributes {dimension_semantics = [#tpu.dimension_semantics<parallel>, #tpu.dimension_semantics<arbitrary>], iteration_bounds = array<i64: 1, 1>, scalar_prefetch = 0 : i64, scratch_operands = 3 : i64, tpu.core_type = #tpu.core_type<tc>, window_params = [{transform_indices = @transform_0, window_bounds = array<i64: 8, 128>}, {transform_indices = @transform_1, window_bounds = array<i64: 8, 1>}, {transform_indices = @transform_2, window_bounds = array<i64: 8, 1>}]} {
    %c0_i32 = arith.constant 0 : i32
    %0 = arith.cmpi eq, %arg1, %c0_i32 : i32
    %1 = arith.extui %0 : i1 to i32
    %c0_i32_0 = arith.constant 0 : i32
    %2 = arith.cmpi ne, %1, %c0_i32_0 : i32
    scf.if %2 {
      %cst_25 = arith.constant -1.70141173E+38 : f32
      %44 = vector.broadcast %cst_25 : f32 to vector<8x1xf32>
      %c0_26 = arith.constant 0 : index
      %c0_27 = arith.constant 0 : index
      %45 = vector.load %arg5[%c0_26, %c0_27] : memref<8x1xf32, #tpu.memory_space<vmem>>, vector<8x1xf32>
      tpu.vector_store %arg5[%c0_26, %c0_27], %44 {strides = array<i32>} : memref<8x1xf32, #tpu.memory_space<vmem>>, vector<8x1xf32>,
      %cst_28 = arith.constant 0.000000e+00 : f32
      %46 = vector.broadcast %cst_28 : f32 to vector<8x1xf32>
      %c0_29 = arith.constant 0 : index
      %c0_30 = arith.constant 0 : index
      %47 = vector.load %arg6[%c0_29, %c0_30] : memref<8x1xf32, #tpu.memory_space<vmem>>, vector<8x1xf32>
      tpu.vector_store %arg6[%c0_29, %c0_30], %46 {strides = array<i32>} : memref<8x1xf32, #tpu.memory_space<vmem>>, vector<8x1xf32>,
      %cst_31 = arith.constant 0.000000e+00 : f32
      %48 = vector.broadcast %cst_31 : f32 to vector<8x1xf32>
      %c0_32 = arith.constant 0 : index
      %c0_33 = arith.constant 0 : index
      %49 = vector.load %arg7[%c0_32, %c0_33] : memref<8x1xf32, #tpu.memory_space<vmem>>, vector<8x1xf32>
      tpu.vector_store %arg7[%c0_32, %c0_33], %48 {strides = array<i32>} : memref<8x1xf32, #tpu.memory_space<vmem>>, vector<8x1xf32>,
    } else {
    }
    %c0 = arith.constant 0 : index
    %c0_1 = arith.constant 0 : index
    %3 = vector.load %arg2[%c0, %c0_1] : memref<8x128xf32, #tpu.memory_space<vmem>>, vector<8x128xf32>
    %c0_2 = arith.constant 0 : index
    %c0_3 = arith.constant 0 : index
    %4 = vector.load %arg3[%c0_2, %c0_3] : memref<8x1xi32, #tpu.memory_space<vmem>>, vector<8x1xi32>
    %c-100_i32 = arith.constant -100 : i32
    %5 = vector.broadcast %c-100_i32 : i32 to vector<8x1xi32>
    %6 = arith.cmpi eq, %4, %5 : vector<8x1xi32>
    %c0_i32_4 = arith.constant 0 : i32
    %7 = vector.broadcast %c0_i32_4 : i32 to vector<8x1xi32>
    %8 = arith.select %6, %7, %4 : vector<8x1xi1>, vector<8x1xi32>
    %cst = arith.constant dense<0xFF800000> : vector<8xf32>
    %9 = vector.multi_reduction <maximumf>, %3, %cst [1] : vector<8x128xf32> to vector<8xf32>
    %10 = vector.shape_cast %9 : vector<8xf32> to vector<8x1xf32>
    %c0_5 = arith.constant 0 : index
    %c0_6 = arith.constant 0 : index
    %11 = vector.load %arg5[%c0_5, %c0_6] : memref<8x1xf32, #tpu.memory_space<vmem>>, vector<8x1xf32>
    %12 = arith.maximumf %11, %10 : vector<8x1xf32>
    %c0_7 = arith.constant 0 : index
    %c0_8 = arith.constant 0 : index
    %13 = vector.load %arg5[%c0_7, %c0_8] : memref<8x1xf32, #tpu.memory_space<vmem>>, vector<8x1xf32>
    %14 = arith.subf %13, %12 : vector<8x1xf32>
    %15 = math.exp %14 : vector<8x1xf32>
    %c0_9 = arith.constant 0 : index
    %c0_10 = arith.constant 0 : index
    %16 = vector.load %arg6[%c0_9, %c0_10] : memref<8x1xf32, #tpu.memory_space<vmem>>, vector<8x1xf32>
    %17 = arith.mulf %16, %15 : vector<8x1xf32>
    %18 = vector.broadcast %12 : vector<8x1xf32> to vector<8x128xf32>
    %19 = arith.subf %3, %18 : vector<8x128xf32>
    %20 = math.exp %19 : vector<8x128xf32>
    %cst_11 = arith.constant dense<0.000000e+00> : vector<8xf32>
    %21 = vector.multi_reduction <add>, %20, %cst_11 [1] : vector<8x128xf32> to vector<8xf32>
    %22 = vector.shape_cast %21 : vector<8xf32> to vector<8x1xf32>
    %23 = arith.addf %17, %22 : vector<8x1xf32>
    %c0_12 = arith.constant 0 : index
    %c0_13 = arith.constant 0 : index
    %24 = vector.load %arg6[%c0_12, %c0_13] : memref<8x1xf32, #tpu.memory_space<vmem>>, vector<8x1xf32>
    tpu.vector_store %arg6[%c0_12, %c0_13], %23 {strides = array<i32>} : memref<8x1xf32, #tpu.memory_space<vmem>>, vector<8x1xf32>,
    %c0_14 = arith.constant 0 : index
    %c0_15 = arith.constant 0 : index
    %25 = vector.load %arg5[%c0_14, %c0_15] : memref<8x1xf32, #tpu.memory_space<vmem>>, vector<8x1xf32>
    tpu.vector_store %arg5[%c0_14, %c0_15], %12 {strides = array<i32>} : memref<8x1xf32, #tpu.memory_space<vmem>>, vector<8x1xf32>,
    %26 = tpu.iota {dimensions = array<i32: 1>} : vector<8x128xi32>
    %c128_i32 = arith.constant 128 : i32
    %27 = arith.muli %arg1, %c128_i32 : i32
    %28 = vector.broadcast %27 : i32 to vector<8x128xi32>
    %29 = arith.addi %26, %28 : vector<8x128xi32>
    %30 = vector.broadcast %8 : vector<8x1xi32> to vector<8x128xi32>
    %31 = arith.cmpi eq, %29, %30 : vector<8x128xi32>
    %cst_16 = arith.constant 0.899999976 : f32
    %cst_17 = arith.constant 7.812500e-04 : f32
    %32 = vector.broadcast %cst_16 : f32 to vector<8x128xf32>
    %33 = vector.broadcast %cst_17 : f32 to vector<8x128xf32>
    %34 = arith.select %31, %32, %33 : vector<8x128xi1>, vector<8x128xf32>
    %c0_18 = arith.constant 0 : index
    %c0_19 = arith.constant 0 : index
    %35 = vector.load %arg7[%c0_18, %c0_19] : memref<8x1xf32, #tpu.memory_space<vmem>>, vector<8x1xf32>
    %36 = arith.mulf %34, %3 : vector<8x128xf32>
    %cst_20 = arith.constant dense<0.000000e+00> : vector<8xf32>
    %37 = vector.multi_reduction <add>, %36, %cst_20 [1] : vector<8x128xf32> to vector<8xf32>
    %38 = vector.shape_cast %37 : vector<8xf32> to vector<8x1xf32>
    %39 = arith.addf %35, %38 : vector<8x1xf32>
    %c0_21 = arith.constant 0 : index
    %c0_22 = arith.constant 0 : index
    %40 = vector.load %arg7[%c0_21, %c0_22] : memref<8x1xf32, #tpu.memory_space<vmem>>, vector<8x1xf32>
    tpu.vector_store %arg7[%c0_21, %c0_22], %39 {strides = array<i32>} : memref<8x1xf32, #tpu.memory_space<vmem>>, vector<8x1xf32>,
    %c0_i32_23 = arith.constant 0 : i32
    %41 = arith.cmpi eq, %arg1, %c0_i32_23 : i32
    %42 = arith.extui %41 : i1 to i32
    %c0_i32_24 = arith.constant 0 : i32
    %43 = arith.cmpi ne, %42, %c0_i32_24 : i32
    scf.if %43 {
      %c0_25 = arith.constant 0 : index
      %c0_26 = arith.constant 0 : index
      %44 = vector.load %arg5[%c0_25, %c0_26] : memref<8x1xf32, #tpu.memory_space<vmem>>, vector<8x1xf32>
      %c0_27 = arith.constant 0 : index
      %c0_28 = arith.constant 0 : index
      %45 = vector.load %arg6[%c0_27, %c0_28] : memref<8x1xf32, #tpu.memory_space<vmem>>, vector<8x1xf32>
      %46 = math.log %45 : vector<8x1xf32>
      %47 = arith.addf %44, %46 : vector<8x1xf32>
      %c-100_i32_29 = arith.constant -100 : i32
      %48 = vector.broadcast %c-100_i32_29 : i32 to vector<8x1xi32>
      %49 = arith.cmpi eq, %4, %48 : vector<8x1xi32>
      %cst_30 = arith.constant 0.000000e+00 : f32
      %cst_31 = arith.constant 1.000000e+00 : f32
      %50 = vector.broadcast %cst_30 : f32 to vector<8x1xf32>
      %51 = vector.broadcast %cst_31 : f32 to vector<8x1xf32>
      %52 = arith.select %49, %50, %51 : vector<8x1xi1>, vector<8x1xf32>
      %cst_32 = arith.constant 0.999218761 : f32
      %53 = vector.broadcast %cst_32 : f32 to vector<8x1xf32>
      %54 = arith.mulf %53, %47 : vector<8x1xf32>
      %c0_33 = arith.constant 0 : index
      %c0_34 = arith.constant 0 : index
      %55 = vector.load %arg7[%c0_33, %c0_34] : memref<8x1xf32, #tpu.memory_space<vmem>>, vector<8x1xf32>
      %56 = arith.subf %54, %55 : vector<8x1xf32>
      %57 = arith.mulf %56, %52 : vector<8x1xf32>
      %c0_35 = arith.constant 0 : index
      %c0_36 = arith.constant 0 : index
      %58 = vector.load %arg4[%c0_35, %c0_36] : memref<8x1xf32, #tpu.memory_space<vmem>>, vector<8x1xf32>
      tpu.vector_store %arg4[%c0_35, %c0_36], %57 {strides = array<i32>} : memref<8x1xf32, #tpu.memory_space<vmem>>, vector<8x1xf32>,
    } else {
    }
    return
  }
  func.func @transform_0(%arg0: i32, %arg1: i32) -> (i32, i32) {
    %c0_i32 = arith.constant 0 : i32
    return %arg0, %arg1 : i32, i32
  }
  func.func @transform_1(%arg0: i32, %arg1: i32) -> (i32, i32) {
    %c0_i32 = arith.constant 0 : i32
    %c0_i32_0 = arith.constant 0 : i32
    return %arg0, %c0_i32 : i32, i32
  }
  func.func @transform_2(%arg0: i32, %arg1: i32) -> (i32, i32) {
    %c0_i32 = arith.constant 0 : i32
    %c0_i32_0 = arith.constant 0 : i32
    return %arg0, %c0_i32 : i32, i32
  }
}

</mosaic_0001>

<bundles_post_ra>
// kernel: tpu_custom_call.1
= control target key start
LH: loop header
LB: loop body
LE: loop exit
PB: predicated region body
PF: predicated region fallthrough
CT: control target
= control target key end

     0   :  { %vm15_vm0 = vcmask 7168   ;;  %v93_v1 = vmov -1.7014117e+38   ;;  %v94_v2 = vmov 0   ;;  %v95_v3 = vmov 0.0   ;;  %s131_s0 = inlined_call_operand.vmem [shape: f32[8,128], index: 0, kind: input, shape index: {}]   ;;  %s132_s1 = inlined_call_operand.vmem [shape: s32[8,1], index: 1, kind: input, shape index: {}]   ;;  %s133_s2 = inlined_call_operand.vmem [shape: f32[8,1], index: 2, kind: output, shape index: {}]  }
   0x1   :  { %v19_v0 = vld [vmem:[%s131_s0] sm:$0xff]  ;;  %16 = vst.msk [vmem:[#allocation2] sm:$0xff] %vm15_vm0, %v93_v1  ;;  %85 = vset.pattern.permute.xlu0 %v94_v2  ;;  %86 = vset.pattern.permute.xlu1 %v94_v2  ;;  %17 = vst.msk [vmem:[#allocation3] sm:$0xff] %vm15_vm0, %v95_v3  ;;  %v46_v12 = vlaneseq  ;;  %v96_v16 = vmov 0.00078125   ;;  %v97_v36 = vmov 1.0  }
   0x2   :  { %23 = vmax.xlane.f32.xlu0 %v19_v0  ;;  %18 = vst.msk [vmem:[#allocation4] sm:$0xff] %vm15_vm0, %v95_v3  ;;  %v20_v4 = vld [vmem:[%s132_s1] sm:$0xff] }
   0x3   :  { %vm21_vm1 = vcmp.eq.s32.totalorder %v20_v4, 4294967196  ;;  %v47_v14 = vand.u32 127, %v46_v12 }
   0x4   :  { %v22_v5 = vsel %vm21_vm1, 0, %v20_v4  ;;  %v70_v37 = vsel %vm21_vm1, 0.0, %v97_v36 }
   0x5   :  { %52 = vperm.xlu1 %86, %v22_v5  }
   0x8   :  { %v25_v6 = vld [vmem:[#allocation2] sm:$0xff]  ;;  %v30_v22 = vld [vmem:[#allocation3] sm:$0xff] }
   0x9   :  { %v56_v26 = vld [vmem:[#allocation4] sm:$0xff] }
  0x84   :  { %v53_v15 = vpop.permute.xlu1 %52 }
  0x85   :  { %vm54_vm2 = vcmp.eq.s32.totalorder %v47_v14, %v53_v15 }
  0x86   :  { %v55_v17 = vsel %vm54_vm2, 0.9, %v96_v16 }
  0x87   :  { %v57_v19 = vmul.f32 %v55_v17, %v19_v0 }
  0x8f   :  { %v24_v7 = vpop.xlane.xlu0 %23 }
  0x90   :  { %v26_v8 = vmax.f32 %v25_v6, %v24_v7 }
  0x92   :  { %v27_v9 = vsub.f32 %v25_v6, %v26_v8  ;;  %45 = vst.msk [vmem:[#allocation2] sm:$0xff] %vm15_vm0, %v26_v8  ;;  %34 = vperm.xlu0 %85, %v26_v8  }
  0x94   :  { %v28_v20 = vmul.f32 1.442695, %v27_v9 }
  0x99   :  { %v65_v32 = vld [vmem:[#allocation2] sm:$0xff] }
 0x111   :  { %v35_v10 = vpop.permute.xlu0 %34 }
 0x112   :  { %v37_v11 = vsub.f32 %v19_v0, %v35_v10 }
 0x114   :  { %v38_v13 = vmul.f32 1.442695, %v37_v11 }
 0x116   :  { %87 = vpow2.f32 %v38_v13 }
 0x117   :  { %89 = vpow2.f32 %v28_v20 }
 0x120   :  { %v88_v18 = vpop.eup %87 }
 0x121   :  { %40 = vadd.xlane.f32.xlu1 %v88_v18  ;;  %v90_v21 = vpop.eup %89 }
 0x122   :  { %v31_v23 = vmul.f32 %v90_v21, %v30_v22 }
 0x125   :  { %58 = vadd.xlane.f32.xlu1 %v57_v19 }
 0x1ae   :  { %v41_v24 = vpop.xlane.xlu1 %40 }
 0x1af   :  { %v42_v25 = vadd.f32 %v41_v24, %v31_v23 }
 0x1b1   :  { %44 = vst.msk [vmem:[#allocation3] sm:$0xff] %vm15_vm0, %v42_v25 }
 0x1b2   :  { %v59_v27 = vpop.xlane.xlu1 %58 }
 0x1b3   :  { %v60_v28 = vadd.f32 %v59_v27, %v56_v26 }
 0x1b5   :  { %61 = vst.msk [vmem:[#allocation4] sm:$0xff] %vm15_vm0, %v60_v28 }
 0x1b8   :  { %v66_v29 = vld [vmem:[#allocation3] sm:$0xff] }
 0x1b9   :  { %91 = vlog2.f32 %v66_v29 }
 0x1bc   :  { %v72_v34 = vld [vmem:[#allocation4] sm:$0xff] }
 0x1c3   :  { %v92_v30 = vpop.eup %91 }
 0x1c4   :  { %v68_v31 = vmul.f32 0.6931472, %v92_v30 }
 0x1c6   :  { %v69_v33 = vadd.f32 %v68_v31, %v65_v32 }
 0x1c8   :  { %v71_v35 = vmul.f32 0.99921876, %v69_v33 }
 0x1ca   :  { %v73_v38 = vsub.f32 %v71_v35, %v72_v34 }
 0x1cc   :  { %v74_v39 = vmul.f32 %v73_v38, %v70_v37 }
 0x1ce   :  { %75 = vst.msk [vmem:[%s133_s2] sm:$0xff] %vm15_vm0, %v74_v39 }

</bundles_post_ra>
